<compile_context>
chip_gen: v7x
topology: tpu7x:2x2x1
jax: 0.10.0
libtpu: 0.0.40
codegen_flags: <defaults>
</compile_context>

<pallas_src>
import jax
import jax.numpy as jnp
from jax import lax
from jax.experimental import pallas as pl
from jax.experimental.pallas import tpu as pltpu

N = 5          # nodes
F_IN = 4       # conv1 in_channels
F_HID = 8      # conv1 out_channels / conv2 in_channels
F_OUT = 2      # conv2 out_channels
NPAD = 8       # sublane-padded node count
LANE = 128     # lane-padded feature width
PROWS = 16     # parameter-slab rows

# Parameter slab layout (rows of the (16, 128) slab):
#   rows 0:4  -> W1 rows  (lanes 0:8)
#   row  4    -> b1       (lanes 0:8)
#   row  5    -> b2       (lanes 0:2)
#   rows 8:16 -> W2 rows  (lanes 0:2)


def gcn_kernel(a_ref, x_ref, p_ref, o_ref):
    a = a_ref[...]                                   # (8, 8)   A + I, zero-padded
    x = x_ref[...]                                   # (8, 128) X, lanes 0:4 valid
    p = p_ref[...]                                   # (16, 128) packed parameters

    # In-kernel symmetric normalization: deg = row-sum(A+I), D^-1/2 as a column.
    # A_hat @ H is computed as  dis * (A @ (dis * H))  (mathematically identical,
    # avoids materializing A_hat and needs no lane-transpose of dis).
    deg = jnp.sum(a, axis=1, keepdims=True)          # (8, 1)
    dis = jnp.where(deg > 0.0, lax.rsqrt(deg), 0.0)  # (8, 1), zero on padded rows

    # ---- Layer 1: GCNConv(4 -> 8) ----
    # Feature transform X @ W1 as unrolled VPU broadcast-FMA over K=4.
    h = x[:, 0:1] * p[0:1, :]
    for k in range(1, F_IN):
        h = h + x[:, k:k + 1] * p[k:k + 1, :]        # (8, 128), lanes 0:8 valid
    # Aggregate on the MXU, then bias + ReLU.
    h = jnp.dot(a, dis * h, preferred_element_type=jnp.float32)
    h = dis * h + p[4:5, :]                          # + b1
    h = jnp.maximum(h, 0.0)                          # ReLU

    # ---- Layer 2: GCNConv(8 -> 2) ----
    # Feature transform H @ W2 as unrolled VPU broadcast-FMA over K=8.
    h2 = h[:, 0:1] * p[8:9, :]
    for k in range(1, F_HID):
        h2 = h2 + h[:, k:k + 1] * p[8 + k:9 + k, :]  # (8, 128), lanes 0:2 valid
    h2 = jnp.dot(a, dis * h2, preferred_element_type=jnp.float32)
    o_ref[...] = dis * h2 + p[5:6, :]                # + b2  (lane-dense store)


def gcn_forward(a_plus_i_pad, x_pad, params):
    # Tiny graph: everything fits in VMEM -> full-array blocks, no grid.
    cost = pl.CostEstimate(
        flops=1024,                       # ~2*(5*4*8 + 5*5*8 + 5*8*2 + 5*5*2)
        transcendentals=NPAD,             # rsqrt per (padded) row
        bytes_accessed=(NPAD * NPAD + NPAD * LANE + PROWS * LANE + NPAD * LANE) * 4,
    )
    out_pad = pl.pallas_call(
        gcn_kernel,
        out_shape=jax.ShapeDtypeStruct((NPAD, LANE), jnp.float32),
        in_specs=[pl.BlockSpec(memory_space=pltpu.MemorySpace.VMEM)] * 3,
        out_specs=pl.BlockSpec(memory_space=pltpu.MemorySpace.VMEM),
        cost_estimate=cost,
    )(a_plus_i_pad, x_pad, params)
    return out_pad[:N, :F_OUT]


def build_adjacency_with_self_loops(edge_index, num_nodes):
    """A + I (unnormalized; D^-1/2 scaling is folded into the kernel)."""
    src, dst = edge_index[0], edge_index[1]
    a = jnp.zeros((num_nodes, num_nodes), dtype=jnp.float32)
    a = a.at[dst, src].add(1.0)                  # message src -> dst
    return a + jnp.eye(num_nodes, dtype=jnp.float32)


def glorot(key, shape):
    fan_in, fan_out = shape
    limit = jnp.sqrt(6.0 / (fan_in + fan_out))
    return jax.random.uniform(key, shape, jnp.float32, -limit, limit)


if __name__ == "__main__":
    # Graph data from the reference script (deterministic).
    x = jnp.array(
        [[1000, 40000, 0.3, 36],
         [2500, 30000, 0.5, 33],
         [1800, 70000, 0.6, 37],
         [3000, 50000, 0.4, 31],
         [1200, 65000, 0.2, 38]], dtype=jnp.float32)          # (5, 4)
    edge_index = jnp.array(
        [[0, 1, 1, 2, 2, 3, 3, 4, 4, 0],
         [1, 0, 2, 1, 3, 2, 4, 3, 0, 4]], dtype=jnp.int32)    # (2, 10)

    # Deterministic parameter init (GCNConv(4,8) and GCNConv(8,2), with bias).
    key = jax.random.PRNGKey(0)
    k1, k2 = jax.random.split(key)
    w1 = glorot(k1, (F_IN, F_HID))
    b1 = jnp.zeros((F_HID,), dtype=jnp.float32)
    w2 = glorot(k2, (F_HID, F_OUT))
    b2 = jnp.zeros((F_OUT,), dtype=jnp.float32)

    # --- Pack lane-dense kernel inputs (3 DMAs total) ---
    a_plus_i = build_adjacency_with_self_loops(edge_index, N)          # (5, 5)
    a_pad = jnp.zeros((NPAD, NPAD), jnp.float32).at[:N, :N].set(a_plus_i)
    x_pad = jnp.zeros((NPAD, LANE), jnp.float32).at[:N, :F_IN].set(x)

    params = jnp.zeros((PROWS, LANE), jnp.float32)
    params = params.at[0:F_IN, 0:F_HID].set(w1)        # W1
    params = params.at[4, 0:F_HID].set(b1)             # b1
    params = params.at[5, 0:F_OUT].set(b2)             # b2
    params = params.at[8:8 + F_HID, 0:F_OUT].set(w2)   # W2

    out = gcn_forward(a_pad, x_pad, params)
    jax.block_until_ready(out)

    # Pure-JAX reference of the same math (explicit A_hat).
    deg = jnp.sum(a_plus_i, axis=1)
    d_inv_sqrt = jnp.where(deg > 0, 1.0 / jnp.sqrt(deg), 0.0)
    a_hat = d_inv_sqrt[:, None] * a_plus_i * d_inv_sqrt[None, :]
    ref = jnp.maximum(a_hat @ (x @ w1) + b1[None, :], 0.0)
    ref = a_hat @ (ref @ w2) + b2[None, :]

    assert out.shape == (N, F_OUT)
    assert jnp.allclose(out, ref, rtol=1e-4, atol=1e-3), "mismatch vs reference"

    print("KERNEL_OK")
</pallas_src>

<mosaic_0001>
module attributes {stable_mosaic.version = 11 : i64} {
  func.func @gcn_kernel(%arg0: memref<8x8xf32, #tpu.memory_space<vmem>>, %arg1: memref<8x128xf32, #tpu.memory_space<vmem>>, %arg2: memref<16x128xf32, #tpu.memory_space<vmem>>, %arg3: memref<8x128xf32, #tpu.memory_space<vmem>>) attributes {dimension_semantics = [], scalar_prefetch = 0 : i64, scratch_operands = 0 : i64, tpu.core_type = #tpu.core_type<tc>} {
    %c0 = arith.constant 0 : index
    %c0_0 = arith.constant 0 : index
    %0 = vector.load %arg0[%c0, %c0_0] : memref<8x8xf32, #tpu.memory_space<vmem>>, vector<8x8xf32>
    %c0_1 = arith.constant 0 : index
    %c0_2 = arith.constant 0 : index
    %1 = vector.load %arg1[%c0_1, %c0_2] : memref<8x128xf32, #tpu.memory_space<vmem>>, vector<8x128xf32>
    %c0_3 = arith.constant 0 : index
    %c0_4 = arith.constant 0 : index
    %2 = vector.load %arg2[%c0_3, %c0_4] : memref<16x128xf32, #tpu.memory_space<vmem>>, vector<16x128xf32>
    %cst = arith.constant dense<0.000000e+00> : vector<8xf32>
    %3 = vector.multi_reduction <add>, %0, %cst [1] : vector<8x8xf32> to vector<8xf32>
    %4 = vector.shape_cast %3 : vector<8xf32> to vector<8x1xf32>
    %cst_5 = arith.constant 0.000000e+00 : f32
    %5 = vector.broadcast %cst_5 : f32 to vector<8x1xf32>
    %6 = arith.cmpf ogt, %4, %5 : vector<8x1xf32>
    %7 = math.rsqrt %4 : vector<8x1xf32>
    %cst_6 = arith.constant 0.000000e+00 : f32
    %8 = vector.broadcast %cst_6 : f32 to vector<8x1xf32>
    %9 = arith.select %6, %7, %8 : vector<8x1xi1>, vector<8x1xf32>
    %10 = vector.extract_strided_slice %1 {offsets = [0, 0], sizes = [8, 1], strides = [1, 1]} : vector<8x128xf32> to vector<8x1xf32>
    %11 = vector.extract_strided_slice %2 {offsets = [0, 0], sizes = [1, 128], strides = [1, 1]} : vector<16x128xf32> to vector<1x128xf32>
    %12 = vector.broadcast %10 : vector<8x1xf32> to vector<8x128xf32>
    %13 = vector.broadcast %11 : vector<1x128xf32> to vector<8x128xf32>
    %14 = arith.mulf %12, %13 : vector<8x128xf32>
    %15 = vector.extract_strided_slice %1 {offsets = [0, 1], sizes = [8, 1], strides = [1, 1]} : vector<8x128xf32> to vector<8x1xf32>
    %16 = vector.extract_strided_slice %2 {offsets = [1, 0], sizes = [1, 128], strides = [1, 1]} : vector<16x128xf32> to vector<1x128xf32>
    %17 = vector.broadcast %15 : vector<8x1xf32> to vector<8x128xf32>
    %18 = vector.broadcast %16 : vector<1x128xf32> to vector<8x128xf32>
    %19 = arith.mulf %17, %18 : vector<8x128xf32>
    %20 = arith.addf %14, %19 : vector<8x128xf32>
    %21 = vector.extract_strided_slice %1 {offsets = [0, 2], sizes = [8, 1], strides = [1, 1]} : vector<8x128xf32> to vector<8x1xf32>
    %22 = vector.extract_strided_slice %2 {offsets = [2, 0], sizes = [1, 128], strides = [1, 1]} : vector<16x128xf32> to vector<1x128xf32>
    %23 = vector.broadcast %21 : vector<8x1xf32> to vector<8x128xf32>
    %24 = vector.broadcast %22 : vector<1x128xf32> to vector<8x128xf32>
    %25 = arith.mulf %23, %24 : vector<8x128xf32>
    %26 = arith.addf %20, %25 : vector<8x128xf32>
    %27 = vector.extract_strided_slice %1 {offsets = [0, 3], sizes = [8, 1], strides = [1, 1]} : vector<8x128xf32> to vector<8x1xf32>
    %28 = vector.extract_strided_slice %2 {offsets = [3, 0], sizes = [1, 128], strides = [1, 1]} : vector<16x128xf32> to vector<1x128xf32>
    %29 = vector.broadcast %27 : vector<8x1xf32> to vector<8x128xf32>
    %30 = vector.broadcast %28 : vector<1x128xf32> to vector<8x128xf32>
    %31 = arith.mulf %29, %30 : vector<8x128xf32>
    %32 = arith.addf %26, %31 : vector<8x128xf32>
    %33 = vector.broadcast %9 : vector<8x1xf32> to vector<8x128xf32>
    %34 = arith.mulf %33, %32 : vector<8x128xf32>
    %cst_7 = arith.constant dense<0.000000e+00> : vector<8x128xf32>
    %35 = tpu.matmul %0, %34, %cst_7 {dimension_numbers = #tpu.dot_dimension_numbers<[1], [0], [0], [1], [0, 0, 1, 1], [], []>} : vector<8x8xf32>, vector<8x128xf32>, vector<8x128xf32> -> vector<8x128xf32>
    %36 = vector.broadcast %9 : vector<8x1xf32> to vector<8x128xf32>
    %37 = arith.mulf %36, %35 : vector<8x128xf32>
    %38 = vector.extract_strided_slice %2 {offsets = [4, 0], sizes = [1, 128], strides = [1, 1]} : vector<16x128xf32> to vector<1x128xf32>
    %39 = vector.broadcast %38 : vector<1x128xf32> to vector<8x128xf32>
    %40 = arith.addf %37, %39 : vector<8x128xf32>
    %cst_8 = arith.constant 0.000000e+00 : f32
    %41 = vector.broadcast %cst_8 : f32 to vector<8x128xf32>
    %42 = arith.maximumf %40, %41 : vector<8x128xf32>
    %43 = vector.extract_strided_slice %42 {offsets = [0, 0], sizes = [8, 1], strides = [1, 1]} : vector<8x128xf32> to vector<8x1xf32>
    %44 = vector.extract_strided_slice %2 {offsets = [8, 0], sizes = [1, 128], strides = [1, 1]} : vector<16x128xf32> to vector<1x128xf32>
    %45 = vector.broadcast %43 : vector<8x1xf32> to vector<8x128xf32>
    %46 = vector.broadcast %44 : vector<1x128xf32> to vector<8x128xf32>
    %47 = arith.mulf %45, %46 : vector<8x128xf32>
    %48 = vector.extract_strided_slice %42 {offsets = [0, 1], sizes = [8, 1], strides = [1, 1]} : vector<8x128xf32> to vector<8x1xf32>
    %49 = vector.extract_strided_slice %2 {offsets = [9, 0], sizes = [1, 128], strides = [1, 1]} : vector<16x128xf32> to vector<1x128xf32>
    %50 = vector.broadcast %48 : vector<8x1xf32> to vector<8x128xf32>
    %51 = vector.broadcast %49 : vector<1x128xf32> to vector<8x128xf32>
    %52 = arith.mulf %50, %51 : vector<8x128xf32>
    %53 = arith.addf %47, %52 : vector<8x128xf32>
    %54 = vector.extract_strided_slice %42 {offsets = [0, 2], sizes = [8, 1], strides = [1, 1]} : vector<8x128xf32> to vector<8x1xf32>
    %55 = vector.extract_strided_slice %2 {offsets = [10, 0], sizes = [1, 128], strides = [1, 1]} : vector<16x128xf32> to vector<1x128xf32>
    %56 = vector.broadcast %54 : vector<8x1xf32> to vector<8x128xf32>
    %57 = vector.broadcast %55 : vector<1x128xf32> to vector<8x128xf32>
    %58 = arith.mulf %56, %57 : vector<8x128xf32>
    %59 = arith.addf %53, %58 : vector<8x128xf32>
    %60 = vector.extract_strided_slice %42 {offsets = [0, 3], sizes = [8, 1], strides = [1, 1]} : vector<8x128xf32> to vector<8x1xf32>
    %61 = vector.extract_strided_slice %2 {offsets = [11, 0], sizes = [1, 128], strides = [1, 1]} : vector<16x128xf32> to vector<1x128xf32>
    %62 = vector.broadcast %60 : vector<8x1xf32> to vector<8x128xf32>
    %63 = vector.broadcast %61 : vector<1x128xf32> to vector<8x128xf32>
    %64 = arith.mulf %62, %63 : vector<8x128xf32>
    %65 = arith.addf %59, %64 : vector<8x128xf32>
    %66 = vector.extract_strided_slice %42 {offsets = [0, 4], sizes = [8, 1], strides = [1, 1]} : vector<8x128xf32> to vector<8x1xf32>
    %67 = vector.extract_strided_slice %2 {offsets = [12, 0], sizes = [1, 128], strides = [1, 1]} : vector<16x128xf32> to vector<1x128xf32>
    %68 = vector.broadcast %66 : vector<8x1xf32> to vector<8x128xf32>
    %69 = vector.broadcast %67 : vector<1x128xf32> to vector<8x128xf32>
    %70 = arith.mulf %68, %69 : vector<8x128xf32>
    %71 = arith.addf %65, %70 : vector<8x128xf32>
    %72 = vector.extract_strided_slice %42 {offsets = [0, 5], sizes = [8, 1], strides = [1, 1]} : vector<8x128xf32> to vector<8x1xf32>
    %73 = vector.extract_strided_slice %2 {offsets = [13, 0], sizes = [1, 128], strides = [1, 1]} : vector<16x128xf32> to vector<1x128xf32>
    %74 = vector.broadcast %72 : vector<8x1xf32> to vector<8x128xf32>
    %75 = vector.broadcast %73 : vector<1x128xf32> to vector<8x128xf32>
    %76 = arith.mulf %74, %75 : vector<8x128xf32>
    %77 = arith.addf %71, %76 : vector<8x128xf32>
    %78 = vector.extract_strided_slice %42 {offsets = [0, 6], sizes = [8, 1], strides = [1, 1]} : vector<8x128xf32> to vector<8x1xf32>
    %79 = vector.extract_strided_slice %2 {offsets = [14, 0], sizes = [1, 128], strides = [1, 1]} : vector<16x128xf32> to vector<1x128xf32>
    %80 = vector.broadcast %78 : vector<8x1xf32> to vector<8x128xf32>
    %81 = vector.broadcast %79 : vector<1x128xf32> to vector<8x128xf32>
    %82 = arith.mulf %80, %81 : vector<8x128xf32>
    %83 = arith.addf %77, %82 : vector<8x128xf32>
    %84 = vector.extract_strided_slice %42 {offsets = [0, 7], sizes = [8, 1], strides = [1, 1]} : vector<8x128xf32> to vector<8x1xf32>
    %85 = vector.extract_strided_slice %2 {offsets = [15, 0], sizes = [1, 128], strides = [1, 1]} : vector<16x128xf32> to vector<1x128xf32>
    %86 = vector.broadcast %84 : vector<8x1xf32> to vector<8x128xf32>
    %87 = vector.broadcast %85 : vector<1x128xf32> to vector<8x128xf32>
    %88 = arith.mulf %86, %87 : vector<8x128xf32>
    %89 = arith.addf %83, %88 : vector<8x128xf32>
    %90 = vector.broadcast %9 : vector<8x1xf32> to vector<8x128xf32>
    %91 = arith.mulf %90, %89 : vector<8x128xf32>
    %cst_9 = arith.constant dense<0.000000e+00> : vector<8x128xf32>
    %92 = tpu.matmul %0, %91, %cst_9 {dimension_numbers = #tpu.dot_dimension_numbers<[1], [0], [0], [1], [0, 0, 1, 1], [], []>} : vector<8x8xf32>, vector<8x128xf32>, vector<8x128xf32> -> vector<8x128xf32>
    %93 = vector.broadcast %9 : vector<8x1xf32> to vector<8x128xf32>
    %94 = arith.mulf %93, %92 : vector<8x128xf32>
    %95 = vector.extract_strided_slice %2 {offsets = [5, 0], sizes = [1, 128], strides = [1, 1]} : vector<16x128xf32> to vector<1x128xf32>
    %96 = vector.broadcast %95 : vector<1x128xf32> to vector<8x128xf32>
    %97 = arith.addf %94, %96 : vector<8x128xf32>
    %c0_10 = arith.constant 0 : index
    %c0_11 = arith.constant 0 : index
    %98 = vector.load %arg3[%c0_10, %c0_11] : memref<8x128xf32, #tpu.memory_space<vmem>>, vector<8x128xf32>
    tpu.vector_store %arg3[%c0_10, %c0_11], %97 {strides = array<i32>} : memref<8x128xf32, #tpu.memory_space<vmem>>, vector<8x128xf32>,
    return
  }
}

</mosaic_0001>

<bundles_post_ra>
// kernel: tpu_custom_call.1
= control target key start
LH: loop header
LB: loop body
LE: loop exit
PB: predicated region body
PF: predicated region fallthrough
CT: control target
= control target key end

     0   :  { %8 = vsyncpa [#allocation3], 0  ;;  %s617_s0 = inlined_call_operand.hbm [shape: f32[8,8], index: 0, kind: input, shape index: {}]   ;;  %s618_s1 = inlined_call_operand.hbm [shape: f32[8,128], index: 1, kind: input, shape index: {}]   ;;  %s619_s2 = inlined_call_operand.hbm [shape: f32[16,128], index: 2, kind: input, shape index: {}]   ;;  %s620_s3 = inlined_call_operand.hbm [shape: f32[8,128], index: 3, kind: output, shape index: {}]  }
   0x1   :  { %9 = vsyncpa [#allocation6], 0 }
   0x2   :  { %10 = vsyncpa [#allocation4], 0  ;;  %s499_s12 = smov [#allocation5]   ;;  %s500_s14 = smov [#allocation2]  }
   0x3   :  { %s27_s13 = sshll.u32 %s499_s12, 4  ;;  %s17_s15 = sshll.u32 %s500_s14, 4  ;;  %s28_s13 = int_to_ptr.vmem [resolvable:$true] %s27_s13  ;;  %s18_s15 = int_to_ptr.vmem [resolvable:$true] %s17_s15 }
   0x4   :  { %s405_s18 = scalar_lea.hbm %s618_s1, 128 }
   0x5   :  { %p406_p0 = scmp.ne.s32.totalorder %s618_s1, %s405_s18  ;;  %p409_p1 = scmp.lt.u32.totalorder %s405_s18, %s618_s1 }
   0x7   :  { %p411_p2 = pnand %p409_p1, %p406_p0 }
   0x9   :  { %414 = shalt.err (!%p411_p2)
}
   0xa   :  { %s415_s23 = scalar_lea.vmem %s28_s13, 128  ;;  %p420_p4 = scmp.lt.s32.totalorder %s28_s13, %s28_s13 }
   0xb   :  { %p416_p3 = scmp.ne.s32.totalorder %s28_s13, %s415_s23  ;;  %p421_p5 = scmp.lt.s32.totalorder %s415_s23, %s415_s23 }
   0xd   :  { %p422_p6 = por %p421_p5, %p420_p4 }
   0xf   :  { %p423_p7 = pnand %p422_p6, %p416_p3 }
  0x11   :  { %426 = shalt.err (!%p423_p7)
}
  0x12   :  { %30 = dma.hbm_to_vmem [thread:$0]  %s618_s1, 128, %s28_s13, [#allocation6]  }
  0x13   :  { %s427_s28 = scalar_lea.hbm %s617_s0, 128 }
  0x14   :  { %p428_p8 = scmp.ne.s32.totalorder %s617_s0, %s427_s28  ;;  %p431_p9 = scmp.lt.u32.totalorder %s427_s28, %s617_s0 }
  0x16   :  { %p433_p10 = pnand %p431_p9, %p428_p8 }
  0x18   :  { %436 = shalt.err (!%p433_p10)
}
  0x19   :  { %s437_s6 = scalar_lea.vmem %s18_s15, 128  ;;  %p442_p12 = scmp.lt.s32.totalorder %s18_s15, %s18_s15 }
  0x1a   :  { %p438_p11 = scmp.ne.s32.totalorder %s18_s15, %s437_s6  ;;  %p443_p13 = scmp.lt.s32.totalorder %s437_s6, %s437_s6 }
  0x1c   :  { %p444_p0 = por %p443_p13, %p442_p12 }
  0x1e   :  { %p445_p1 = pnand %p444_p0, %p438_p11 }
  0x20   :  { %448 = shalt.err (!%p445_p1)
}
  0x21   :  { %20 = dma.hbm_to_vmem [thread:$0]  %s617_s0, 128, %s18_s15, [#allocation3]  }
  0x22   :  { %s501_s8 = smov [#allocation7]   ;;  %s449_s12 = scalar_lea.hbm %s619_s2, 256 }
  0x23   :  { %s36_s9 = sshll.u32 %s501_s8, 4  ;;  %p450_p2 = scmp.ne.s32.totalorder %s619_s2, %s449_s12  ;;  %s37_s9 = int_to_ptr.vmem [resolvable:$true] %s36_s9 }
  0x24   :  { %p453_p3 = scmp.lt.u32.totalorder %s449_s12, %s619_s2 }
  0x26   :  { %p455_p4 = pnand %p453_p3, %p450_p2 }
  0x28   :  { %458 = shalt.err (!%p455_p4)
}
  0x29   :  { %s459_s18 = scalar_lea.vmem %s37_s9, 256  ;;  %p464_p6 = scmp.lt.s32.totalorder %s37_s9, %s37_s9 }
  0x2a   :  { %p460_p5 = scmp.ne.s32.totalorder %s37_s9, %s459_s18  ;;  %p465_p7 = scmp.lt.s32.totalorder %s459_s18, %s459_s18 }
  0x2c   :  { %p466_p8 = por %p465_p7, %p464_p6 }
  0x2e   :  { %p467_p9 = pnand %p466_p8, %p460_p5 }
  0x30   :  { %470 = shalt.err (!%p467_p9)
}
  0x31   :  { %s502_s0 = smov 128   ;;  %s503_s15 = smov 8  }
  0x32   :  { %42 = dma.hbm_to_vmem [thread:$0]  %s619_s2, 256, %s37_s9, [#allocation6], %s502_s0, %s502_s0, %s503_s15  }
  0x33   :  { %493 = dma.done.wait [#allocation3], 128  }
  0x34   :  { %494 = vsyncadd [#allocation3], 4294967168 }
  0x35   :  { %495 = dma.done.wait [#allocation6], 384  }
  0x36   :  { %496 = vsyncadd [#allocation6], 4294966912  ;;  %v504_v0 = vmov 1   ;;  %v505_v1 = vmov 0   ;;  %vm56_vm0 = vcmask 64512   ;;  %v572_v2 = vld [vmem:[#allocation2] sm:$0xff]  ;;  %v68_v8 = vlaneseq }
  0x37   :  { %391 = vset.pattern.permute.xlu1 %v504_v0  ;;  %390 = vset.pattern.permute.xlu0 %v505_v1  ;;  %v53_v3 = vld [vmem:[#allocation5] sm:$0xff]  ;;  %v57_v4 = vsel %vm56_vm0, %v572_v2, 0.0  ;;  %v506_v5 = vmov 2   ;;  %v507_v6 = vmov 3   ;;  %v508_v7 = vmov 0.0   ;;  %v580_v14 = vld [vmem:[#allocation7] sm:$0xff] }
  0x38   :  { %74 = vperm.xlu1 %391, %v53_v3   ;;  %58 = vadd.xlane.f32.xlu0 %v57_v4  ;;  %vm509_vm1 = vmmov 0   ;;  %v576_v10 = vshrl.u32 %v68_v8, 7  ;;  %v510_v34 = vmov 7   ;;  %v511_v42 = vmov 4   ;;  %v55_v49 = vld [vmem:[#allocation7 + $0x8] sm:$0xff]  ;;  %s514_s2 = smov [#allocation8]  }
  0x39   :  { %364 = vmatprep.subr.mxu0 %v508_v7  ;;  %369 = vmatprep.subr.mxu1 %v508_v7  ;;  %v512_v43 = vmov 5   ;;  %v513_v44 = vmov 6   ;;  %s348_s21 = sshll.u32 %s514_s2, 4  ;;  %s349_s21 = int_to_ptr.vmem [resolvable:$true] %s348_s21 }
  0x3a   :  { %366 = vmatprep.mubr.msk.f32.mxu0 %vm509_vm1, %v508_v7  ;;  %371 = vmatprep.mubr.msk.f32.mxu1 %vm509_vm1, %v508_v7  ;;  %v79_v12 = vsub.s32 1, %v576_v10  ;;  %v70_v13 = vsub.s32 0, %v576_v10  ;;  %v89_v16 = vsub.s32 2, %v576_v10  ;;  %v99_v17 = vsub.s32 3, %v576_v10  ;;  %s471_s22 = scalar_lea.vmem %s349_s21, 128  ;;  %p476_p11 = scmp.lt.s32.totalorder %s349_s21, %s349_s21 }
  0x3b   :  { %v180_v35 = vsub.s32 4, %v576_v10  ;;  %v240_v56 = vsub.s32 5, %v576_v10  ;;  %v250_v60 = vsub.s32 6, %v576_v10  ;;  %p472_p10 = scmp.ne.s32.totalorder %s349_s21, %s471_s22  ;;  %p477_p12 = scmp.lt.s32.totalorder %s471_s22, %s471_s22 }
  0x3c   :  { %392 = vset.pattern.permute.xlu1 %v506_v5  ;;  %v80_v18 = vrot.slane %v580_v14, %v79_v12  ;;  %v71_v19 = vrot.slane %v580_v14, %v70_v13  ;;  %v90_v20 = vrot.slane %v580_v14, %v89_v16  ;;  %v100_v21 = vrot.slane %v580_v14, %v99_v17 }
  0x3d   :  { %84 = vperm.xlu1 %392, %v53_v3   ;;  %v181_v36 = vrot.slane %v580_v14, %v180_v35  ;;  %v201_v50 = vrot.slane %v55_v49, %v79_v12  ;;  %v192_v51 = vrot.slane %v55_v49, %v70_v13  ;;  %v211_v52 = vrot.slane %v55_v49, %v89_v16  ;;  %p478_p13 = por %p477_p12, %p476_p11 }
  0x3e   :  { %v221_v55 = vrot.slane %v55_v49, %v99_v17  ;;  %v231_v59 = vrot.slane %v55_v49, %v180_v35  ;;  %v251_v4 = vrot.slane %v55_v49, %v250_v60 }
  0x3f   :  { %p479_p0 = pnand %p478_p13, %p472_p10 }
  0x41   :  { %393 = vset.pattern.permute.xlu1 %v507_v6 }
  0x42   :  { %94 = vperm.xlu1 %393, %v53_v3  }
  0x46   :  { %394 = vset.pattern.permute.xlu1 %v505_v1 }
  0x4e   :  { %65 = vperm.xlu0 %390, %v53_v3  }
  0x52   :  { %402 = vset.pattern.permute.xlu0 %v510_v34 }
  0xb7   :  { %v75_v9 = vpop.permute.xlu1 %74 }
  0xb8   :  { %v81_v24 = vmul.f32 %v80_v18, %v75_v9 }
  0xbc   :  { %v85_v15 = vpop.permute.xlu1 %84 }
  0xbd   :  { %v91_v26 = vmul.f32 %v90_v20, %v85_v15  ;;  %v339_v20 = vrot.slane %v580_v14, %v240_v56 }
  0xc1   :  { %v95_v23 = vpop.permute.xlu1 %94 }
  0xc2   :  { %v101_v28 = vmul.f32 %v100_v21, %v95_v23 }
  0xc5   :  { %v59_v11 = vpop.xlane.xlu0 %58 }
  0xc6   :  { %403 = vrsqrt.f32 %v59_v11  ;;  %vm60_vm2 = vcmp.gt.f32.partialorder %v59_v11, 0.0 }
  0xcd   :  { %v66_v22 = vpop.permute.xlu0 %65 }
  0xce   :  { %v72_v25 = vmul.f32 %v71_v19, %v66_v22 }
  0xd0   :  { %v82_v27 = vadd.f32 %v81_v24, %v72_v25  ;;  %v404_v29 = vpop.eup %403 }
  0xd1   :  { %v588_v32 = vsel %vm60_vm2, %v404_v29, 0.0 }
  0xd2   :  { %v92_v30 = vadd.f32 %v91_v26, %v82_v27 }
  0xd4   :  { %v102_v31 = vadd.f32 %v101_v28, %v92_v30 }
  0xd6   :  { %v103_v33 = vmul.f32 %v102_v31, %v588_v32 }
  0xd8   :  { %365 = vmatpush3.msra.mxu0 %v103_v33 }
  0xd9   :  { %367 = vmatmul.mubr.msk.f32.vlgmr.msra.gmra.mrb[0].mxu0 %vm56_vm0, %v572_v2 }
 0x1ac   :  { %v173_v37 = vpop.f32.mrb[0].mxu0 }
 0x1ad   :  { %v177_v38 = vmul.f32 %v173_v37, %v588_v32  ;;  %v368_v39 = vpop.f32.mrb[1].mxu0 }
 0x1af   :  { %v182_v40 = vadd.f32 %v181_v36, %v177_v38 }
 0x1b1   :  { %v183_v41 = vmax.f32 %v182_v40, 0.0 }
 0x1b3   :  { %186 = vperm.xlu1 %394, %v183_v41  }
 0x1b7   :  { %395 = vset.pattern.permute.xlu1 %v504_v0  ;;  %v241_v0 = vrot.slane %v55_v49, %v240_v56 }
 0x1b8   :  { %195 = vperm.xlu1 %395, %v183_v41  }
 0x1bc   :  { %396 = vset.pattern.permute.xlu1 %v506_v5  ;;  %v260_v5 = vsub.s32 7, %v576_v10 }
 0x1bd   :  { %205 = vperm.xlu1 %396, %v183_v41  }
 0x1be   :  { %v261_v12 = vrot.slane %v55_v49, %v260_v5 }
 0x1c1   :  { %397 = vset.pattern.permute.xlu1 %v507_v6 }
 0x1c2   :  { %215 = vperm.xlu1 %397, %v183_v41  }
 0x1c6   :  { %398 = vset.pattern.permute.xlu1 %v511_v42 }
 0x1c7   :  { %225 = vperm.xlu1 %398, %v183_v41  }
 0x1cb   :  { %399 = vset.pattern.permute.xlu1 %v512_v43 }
 0x1cc   :  { %235 = vperm.xlu1 %399, %v183_v41  }
 0x1d0   :  { %400 = vset.pattern.permute.xlu1 %v513_v44 }
 0x1d1   :  { %245 = vperm.xlu1 %400, %v183_v41  }
 0x1d5   :  { %401 = vset.pattern.permute.xlu1 %v510_v34 }
 0x1d6   :  { %255 = vperm.xlu1 %401, %v183_v41  }
 0x232   :  { %v187_v45 = vpop.permute.xlu1 %186 }
 0x233   :  { %v193_v57 = vmul.f32 %v192_v51, %v187_v45 }
 0x237   :  { %v196_v46 = vpop.permute.xlu1 %195 }
 0x238   :  { %v202_v54 = vmul.f32 %v201_v50, %v196_v46 }
 0x23a   :  { %v203_v62 = vadd.f32 %v202_v54, %v193_v57 }
 0x23c   :  { %v206_v47 = vpop.permute.xlu1 %205 }
 0x23d   :  { %v212_v58 = vmul.f32 %v211_v52, %v206_v47 }
 0x23f   :  { %v213_v1 = vadd.f32 %v212_v58, %v203_v62 }
 0x241   :  { %v216_v48 = vpop.permute.xlu1 %215 }
 0x242   :  { %v222_v63 = vmul.f32 %v221_v55, %v216_v48 }
 0x244   :  { %v223_v6 = vadd.f32 %v222_v63, %v213_v1 }
 0x246   :  { %v226_v53 = vpop.permute.xlu1 %225 }
 0x247   :  { %v232_v3 = vmul.f32 %v231_v59, %v226_v53 }
 0x249   :  { %v233_v9 = vadd.f32 %v232_v3, %v223_v6 }
 0x24b   :  { %v236_v61 = vpop.permute.xlu1 %235 }
 0x24c   :  { %v242_v7 = vmul.f32 %v241_v0, %v236_v61 }
 0x24e   :  { %v243_v13 = vadd.f32 %v242_v7, %v233_v9 }
 0x250   :  { %v246_v8 = vpop.permute.xlu1 %245 }
 0x251   :  { %v252_v11 = vmul.f32 %v251_v4, %v246_v8 }
 0x253   :  { %v253_v16 = vadd.f32 %v252_v11, %v243_v13 }
 0x255   :  { %v256_v15 = vpop.permute.xlu1 %255 }
 0x256   :  { %v262_v17 = vmul.f32 %v261_v12, %v256_v15 }
 0x258   :  { %v263_v18 = vadd.f32 %v262_v17, %v253_v16 }
 0x25a   :  { %v264_v19 = vmul.f32 %v263_v18, %v588_v32 }
 0x25c   :  { %370 = vmatpush3.msra.mxu1 %v264_v19 }
 0x25d   :  { %372 = vmatmul.mubr.msk.f32.vlgmr.msra.gmra.mrb[0].mxu1 %vm56_vm0, %v572_v2 }
 0x330   :  { %v331_v10 = vpop.f32.mrb[0].mxu1 }
 0x331   :  { %v335_v21 = vmul.f32 %v331_v10, %v588_v32  ;;  %v373_v22 = vpop.f32.mrb[1].mxu1 }
 0x333   :  { %v340_v23 = vadd.f32 %v339_v20, %v335_v21 }
 0x335   :  { %341 = vst [vmem:[#allocation8] sm:$0xff] %v340_v23 }
 0x336   :  { %482 = shalt.err (!%p479_p0)
}
 0x337   :  { %s483_s25 = scalar_lea.hbm %s620_s3, 128 }
 0x338   :  { %p484_p1 = scmp.ne.s32.totalorder %s620_s3, %s483_s25  ;;  %p487_p2 = scmp.lt.u32.totalorder %s483_s25, %s620_s3 }
 0x33a   :  { %p489_p3 = pnand %p487_p2, %p484_p1 }
 0x33c   :  { %492 = shalt.err (!%p489_p3)
}
 0x33d   :  { %351 = dma.vmem_to_hbm [thread:$0]  %s349_s21, 128, %s620_s3, [#allocation4]  }
 0x33e   :  { %497 = dma.done.wait [#allocation4], 128  }
 0x33f   :  { %498 = vsyncadd [#allocation4], 4294967168 }
 0x340   :  { %355 = vsyncpa [#allocation3], 1 }
 0x341   :  { %356 = vsyncpa [#allocation6], 1 }
 0x342   :  { %357 = vsyncpa [#allocation4], 1 }

</bundles_post_ra>
